<compile_context>
chip_gen: v5e
topology: v5e:2x2
jax: 0.10.0
libtpu: 0.0.40
codegen_flags: <defaults>
</compile_context>

<pallas_src>
import numpy as np
import jax
import jax.numpy as jnp
from jax import lax
from jax.experimental import pallas as pl
from jax.experimental.pallas import tpu as pltpu


# ----------------------------- parameter setup ------------------------------
# BARF-style Taylor expansions (match transforms.lie exactly, nth=10).
# TODO(synk): Pose.__init__ extras (ref_ext.json loading, random noise transform,
#             SE3_to_se3 of the init pose) are constructor logic, not forward().

def _taylor_A(x, nth=10):  # sin(x)/x
    ans = jnp.zeros_like(x)
    denom = 1.0
    for i in range(nth + 1):
        if i > 0:
            denom *= (2 * i) * (2 * i + 1)
        ans = ans + ((-1.0) ** i) * x ** (2 * i) / denom
    return ans


def _taylor_B(x, nth=10):  # (1-cos(x))/x^2
    ans = jnp.zeros_like(x)
    denom = 1.0
    for i in range(nth + 1):
        denom *= (2 * i + 1) * (2 * i + 2)
        ans = ans + ((-1.0) ** i) * x ** (2 * i) / denom
    return ans


def _taylor_C(x, nth=10):  # (x-sin(x))/x^3
    ans = jnp.zeros_like(x)
    denom = 1.0
    for i in range(nth + 1):
        denom *= (2 * i + 2) * (2 * i + 3)
        ans = ans + ((-1.0) ** i) * x ** (2 * i) / denom
    return ans


def _skew(w):
    w0, w1, w2 = w[0], w[1], w[2]
    z = jnp.zeros((), dtype=w.dtype)
    return jnp.stack([
        jnp.stack([z, -w2, w1]),
        jnp.stack([w2, z, -w0]),
        jnp.stack([-w1, w0, z]),
    ])


def se3_to_SE3(wu):
    """wu: [6] -> SE3 matrix [3, 4] (transforms.lie.se3_to_SE3)."""
    w, u = wu[:3], wu[3:]
    wx = _skew(w)
    theta = jnp.linalg.norm(w)
    I = jnp.eye(3, dtype=wu.dtype)
    A = _taylor_A(theta)
    B = _taylor_B(theta)
    C = _taylor_C(theta)
    R = I + A * wx + B * (wx @ wx)
    V = I + B * wx + C * (wx @ wx)
    t = V @ u
    return jnp.concatenate([R, t[:, None]], axis=-1)  # [3, 4]


# ------------------------- lane-dense coefficient table ----------------------

def _shift_coeff_table(c2l44):
    """Build the (8, 128) coefficient table W used by the packed kernel.

    Packed layout: lane c of a packed row holds element (c % 4) of pose row
    (c // 4) within a group of 32 consecutive pose rows.  The composed output is
        out[:, c] = sum_k x[:, 4*(c//4) + k] * c2l44[k, c % 4]
                  = sum_{s=-3..3} roll(x, s, lanes)[:, c] * W[s+3, c]
    with W[s+3, c] = c2l44[(c%4) - s, c%4] where 0 <= (c%4)-s <= 3, else 0.
    The zeroed invalid entries are what keep the cyclic 128-lane wrap of
    pltpu.roll from mixing adjacent pose rows at lanes 0-3 / 124-127.
    Row 7 is zero padding so the table is a clean (8, 128) f32 tile.
    """
    cols = jnp.arange(128, dtype=jnp.int32)
    jmod = cols % 4
    rows = []
    for s in range(-3, 4):
        k = jmod - s
        valid = (k >= 0) & (k <= 3)
        kc = jnp.clip(k, 0, 3)
        rows.append(jnp.where(valid, c2l44[kc, jmod], jnp.float32(0.0)))
    rows.append(jnp.zeros((128,), dtype=jnp.float32))
    return jnp.stack(rows, axis=0).astype(jnp.float32)  # (8, 128)


# ------------------------------ Pallas kernel --------------------------------

def make_compose_kernel(chunk, n_chunks):
    """Lane-dense packed pose composition over a (tm, 128) tile.

    x_ref  : [tm, 128]  packed l2w rows (32 pose rows per packed row), f32 or bf16
    w_ref  : [8, 128]   resident shift-coefficient table built from homog(c2l)
    out_ref: [tm, 128]  packed composed rows, same dtype as x_ref

    The tile is processed in (chunk, 128) row blocks inside an unrolled
    fori_loop so the 7 rolled temporaries stay within the 64-vreg budget and
    never materialize to VMEM (v5e has a single vst slot).
    """
    def compose_kernel(x_ref, w_ref, out_ref):
        # Hoist the coefficient rows once per tile (keeps the vld slot quiet).
        w = w_ref[...]
        coeffs = [w[r:r + 1, :] for r in range(7)]

        def body(c, carry):
            i = pl.multiple_of(c * chunk, chunk)
            x = x_ref[pl.ds(i, chunk), :].astype(jnp.float32)
            acc = x * coeffs[3]                               # shift s = 0
            for s in (-3, -2, -1, 1, 2, 3):
                xs = pltpu.roll(x, shift=s % 128, axis=1)     # XLU, cheap
                acc = acc + xs * coeffs[s + 3]                # VPU FMA
            out_ref[pl.ds(i, chunk), :] = acc.astype(out_ref.dtype)
            return carry

        lax.fori_loop(0, n_chunks, body, 0, unroll=True)

    return compose_kernel


# ------------------------------ wrapper ---------------------------------------

def _round_up(n, m):
    return ((n + m - 1) // m) * m


def _cdiv(a, b):
    return -(-a // b)


_TM_MAX = 2048             # packed rows per tile (~1 MiB f32) -> ~85-90% HBM roofline
_MIN_TM = 16               # sublane-aligned for both f32 (8,128) and bf16 (16,128)
_CHUNK = 128               # in-kernel row chunk; bounds vreg live ranges
_SMALL_M_THRESHOLD = 1 << 18   # pose rows; below this the XLA einsum fallback wins


def pose_forward(l2w, ext_weight, init_se3, use_pallas=None):
    """Pose.forward: given lidar->world poses [..., 3, 4], return cam->world poses."""
    # SE3(): parameter setup in plain JAX.
    c2l = se3_to_SE3((ext_weight[0] + init_se3).astype(jnp.float32))   # [3, 4]
    last_row = jnp.array([[0.0, 0.0, 0.0, 1.0]], dtype=jnp.float32)
    c2l44 = jnp.concatenate([c2l, last_row], axis=0)                   # [4, 4]

    batch_shape = l2w.shape[:-2]
    M = int(np.prod(batch_shape, dtype=np.int64)) * 3                  # pose rows
    orig_dtype = l2w.dtype
    l2w_flat = l2w.reshape(M, 4)            # keep original dtype (bf16 stays bf16)

    if use_pallas is None:
        use_pallas = M >= _SMALL_M_THRESHOLD
    if not use_pallas:
        # Small/medium-M fallback: launch overhead dominates a mem-bound kernel.
        out_flat = jnp.einsum('mk,kj->mj', l2w_flat.astype(jnp.float32), c2l44,
                              precision=jax.lax.Precision.HIGHEST)
        return out_flat.reshape(*batch_shape, 3, 4).astype(orig_dtype)

    # --- lane-dense repack: (M, 4) -> (P, 128), a free row-major view when
    #     M is already a multiple of 32 ------------------------------------------
    P = _cdiv(M, 32)

    if P <= _CHUNK:
        # Tiny input: a single padded tile (copies are negligible at this size).
        tm = max(_MIN_TM, _round_up(P, _MIN_TM))
        chunk = tm
        grid_steps = 1
        m_target = tm * 32
    else:
        # Even number of ~1 MiB tiles -> balanced split across v7x's two
        # TensorCores via dimension_semantics=("parallel",).
        n_steps = max(2, 2 * _cdiv(P, 2 * _TM_MAX))
        tm = _round_up(_cdiv(P, n_steps), _CHUNK)
        chunk = _CHUNK
        grid_steps = _cdiv(P, tm)           # partial last block: Pallas masks it
        m_target = P * 32                   # pad only to a multiple of 32 (view)

    if m_target != M:
        # Needed for the (P, 128) reshape (and exact tile coverage in the tiny
        # path).  TODO(synk): for huge M with M % 32 != 0 this jnp.pad is a full
        # HBM copy; callers with big workloads normally have M % 32 == 0.
        l2w_flat = jnp.pad(l2w_flat, ((0, m_target - M), (0, 0)))
    x_packed = l2w_flat.reshape(m_target // 32, 128)

    w_table = _shift_coeff_table(c2l44)     # (8, 128), resident constant

    n_chunks = tm // chunk
    out_packed = pl.pallas_call(
        make_compose_kernel(chunk, n_chunks),
        out_shape=jax.ShapeDtypeStruct(x_packed.shape, orig_dtype),
        grid=(grid_steps,),
        in_specs=[
            pl.BlockSpec((tm, 128), lambda i: (i, 0)),   # streamed row tiles
            pl.BlockSpec((8, 128), lambda i: (0, 0)),    # constant, stays resident
        ],
        out_specs=pl.BlockSpec((tm, 128), lambda i: (i, 0)),
        compiler_params=pltpu.CompilerParams(
            dimension_semantics=("parallel",),           # shard tiles across TCs (v7x)
            vmem_limit_bytes=32 * 1024 * 1024,           # ~4.5 MiB actually used
        ),
    )(x_packed, w_table)

    # Keep the [:M] slice: tail pose rows (32-pad and partial-block garbage) must
    # be discarded before the final reshape.
    out_flat = out_packed.reshape(m_target, 4)[:M]
    return out_flat.reshape(*batch_shape, 3, 4)


# ------------------------------ reference ------------------------------------

def pose_forward_ref(l2w, ext_weight, init_se3):
    c2l = se3_to_SE3(ext_weight[0] + init_se3)        # [3, 4]
    hi = jax.lax.Precision.HIGHEST
    R_a, t_a = c2l[:, :3], c2l[:, 3]                  # [3,3], [3]
    R_b, t_b = l2w[..., :3], l2w[..., 3]              # [...,3,3], [...,3]
    R_new = jnp.einsum('...ij,jk->...ik', R_b, R_a, precision=hi)
    t_new = jnp.einsum('...ij,j->...i', R_b, t_a, precision=hi) + t_b
    return jnp.concatenate([R_new, t_new[..., None]], axis=-1)   # [..., 3, 4]


# --------------------------------- main ---------------------------------------

if __name__ == "__main__":
    key = jax.random.PRNGKey(0)
    k1, k2, k3, k4 = jax.random.split(key, 4)

    # Parameters (deterministic, synthetic — mirrors nn.Embedding(1, 6) zero-init
    # plus a fixed se3 `init` vector).
    ext_weight = jnp.zeros((1, 6), dtype=jnp.float32)
    init_se3 = jnp.array([0.10, -0.20, 0.30, 0.50, -0.40, 0.25], dtype=jnp.float32)

    # Test 1: spec-sized small input (batch=2, seq=8); force the Pallas path so
    # the kernel definitely runs (auto-dispatch would pick the XLA fallback here).
    l2w_small = jax.random.normal(k1, (2, 8, 3, 4), dtype=jnp.float32)
    out_small = jax.block_until_ready(
        pose_forward(l2w_small, ext_weight, init_se3, use_pallas=True))
    ref_small = pose_forward_ref(l2w_small, ext_weight, init_se3)
    np.testing.assert_allclose(np.asarray(out_small), np.asarray(ref_small),
                               rtol=1e-5, atol=1e-5)
    assert out_small.shape == (2, 8, 3, 4) and out_small.dtype == jnp.float32

    # Test 2: larger input exercising the balanced 2-step grid (768-row tiles) and
    # the in-kernel chunk loop.  The allclose also covers the edge-lane concern:
    # pose rows 0 and 31 of every 32-row group map to lanes 0-3 / 124-127, where
    # the zeroed coefficients must suppress the cyclic roll wrap.
    l2w_big = jax.random.normal(k2, (16, 1024, 3, 4), dtype=jnp.float32)
    out_big = jax.block_until_ready(
        pose_forward(l2w_big, ext_weight, init_se3, use_pallas=True))
    ref_big = pose_forward_ref(l2w_big, ext_weight, init_se3)
    np.testing.assert_allclose(np.asarray(out_big), np.asarray(ref_big),
                               rtol=1e-5, atol=1e-5)
    assert out_big.shape == (16, 1024, 3, 4) and out_big.dtype == jnp.float32

    # Test 3: ragged shape (M % 32 != 0 and P % tm != 0) — exercises the
    # partial-last-block path (no round_up(P, tm) padding) and the [:M] slice.
    l2w_ragged = jax.random.normal(k3, (5, 700, 3, 4), dtype=jnp.float32)
    out_r = jax.block_until_ready(
        pose_forward(l2w_ragged, ext_weight, init_se3, use_pallas=True))
    ref_r = pose_forward_ref(l2w_ragged, ext_weight, init_se3)
    np.testing.assert_allclose(np.asarray(out_r), np.asarray(ref_r),
                               rtol=1e-5, atol=1e-5)
    assert out_r.shape == (5, 700, 3, 4)

    # Test 4: bf16 pass-through — kernel loads bf16, computes in f32, stores bf16
    # (halves HBM bytes; results differ from the f32 reference at bf16 precision).
    l2w_bf16 = jax.random.normal(k4, (4, 512, 3, 4), dtype=jnp.float32).astype(jnp.bfloat16)
    out_bf = jax.block_until_ready(
        pose_forward(l2w_bf16, ext_weight, init_se3, use_pallas=True))
    ref_bf = pose_forward_ref(l2w_bf16.astype(jnp.float32), ext_weight, init_se3)
    np.testing.assert_allclose(np.asarray(out_bf.astype(jnp.float32)),
                               np.asarray(ref_bf), rtol=2e-2, atol=2e-2)
    assert out_bf.dtype == jnp.bfloat16

    print("KERNEL_OK")
</pallas_src>

<mosaic_0001>
module attributes {stable_mosaic.version = 11 : i64} {
  func.func @compose_kernel(%arg0: i32, %arg1: memref<16x128xf32, #tpu.memory_space<vmem>>, %arg2: memref<8x128xf32, #tpu.memory_space<vmem>>, %arg3: memref<16x128xf32, #tpu.memory_space<vmem>>) attributes {dimension_semantics = [#tpu.dimension_semantics<parallel>], iteration_bounds = array<i64: 1>, scalar_prefetch = 0 : i64, scratch_operands = 0 : i64, tpu.core_type = #tpu.core_type<tc>, window_params = [{transform_indices = @transform_0, window_bounds = array<i64: 16, 128>}, {pipeline_mode = #tpu.pipeline_mode<synchronous>, transform_indices = @transform_1, window_bounds = array<i64: 8, 128>}, {transform_indices = @transform_2, window_bounds = array<i64: 16, 128>}]} {
    %c0 = arith.constant 0 : index
    %c0_0 = arith.constant 0 : index
    %0 = vector.load %arg2[%c0, %c0_0] : memref<8x128xf32, #tpu.memory_space<vmem>>, vector<8x128xf32>
    %1 = vector.extract_strided_slice %0 {offsets = [0, 0], sizes = [1, 128], strides = [1, 1]} : vector<8x128xf32> to vector<1x128xf32>
    %2 = vector.extract_strided_slice %0 {offsets = [1, 0], sizes = [1, 128], strides = [1, 1]} : vector<8x128xf32> to vector<1x128xf32>
    %3 = vector.extract_strided_slice %0 {offsets = [2, 0], sizes = [1, 128], strides = [1, 1]} : vector<8x128xf32> to vector<1x128xf32>
    %4 = vector.extract_strided_slice %0 {offsets = [3, 0], sizes = [1, 128], strides = [1, 1]} : vector<8x128xf32> to vector<1x128xf32>
    %5 = vector.extract_strided_slice %0 {offsets = [4, 0], sizes = [1, 128], strides = [1, 1]} : vector<8x128xf32> to vector<1x128xf32>
    %6 = vector.extract_strided_slice %0 {offsets = [5, 0], sizes = [1, 128], strides = [1, 1]} : vector<8x128xf32> to vector<1x128xf32>
    %7 = vector.extract_strided_slice %0 {offsets = [6, 0], sizes = [1, 128], strides = [1, 1]} : vector<8x128xf32> to vector<1x128xf32>
    %c0_i32 = arith.constant 0 : i32
    %c16_i32 = arith.constant 16 : i32
    %8 = arith.muli %c0_i32, %c16_i32 : i32
    %9 = tpu.assume_multiple %8, 16 : i32
    %10 = arith.index_cast %9 : i32 to index
    %c0_1 = arith.constant 0 : index
    %11 = vector.load %arg1[%10, %c0_1] : memref<16x128xf32, #tpu.memory_space<vmem>>, vector<16x128xf32>
    %12 = vector.broadcast %4 : vector<1x128xf32> to vector<16x128xf32>
    %13 = arith.mulf %11, %12 : vector<16x128xf32>
    %c125_i32 = arith.constant 125 : i32
    %14 = tpu.dynamic_rotate %11 by %c125_i32 dim 1 : vector<16x128xf32>, i32 -> vector<16x128xf32>
    %15 = vector.broadcast %1 : vector<1x128xf32> to vector<16x128xf32>
    %16 = arith.mulf %14, %15 : vector<16x128xf32>
    %17 = arith.addf %13, %16 : vector<16x128xf32>
    %c126_i32 = arith.constant 126 : i32
    %18 = tpu.dynamic_rotate %11 by %c126_i32 dim 1 : vector<16x128xf32>, i32 -> vector<16x128xf32>
    %19 = vector.broadcast %2 : vector<1x128xf32> to vector<16x128xf32>
    %20 = arith.mulf %18, %19 : vector<16x128xf32>
    %21 = arith.addf %17, %20 : vector<16x128xf32>
    %c127_i32 = arith.constant 127 : i32
    %22 = tpu.dynamic_rotate %11 by %c127_i32 dim 1 : vector<16x128xf32>, i32 -> vector<16x128xf32>
    %23 = vector.broadcast %3 : vector<1x128xf32> to vector<16x128xf32>
    %24 = arith.mulf %22, %23 : vector<16x128xf32>
    %25 = arith.addf %21, %24 : vector<16x128xf32>
    %c1_i32 = arith.constant 1 : i32
    %26 = tpu.dynamic_rotate %11 by %c1_i32 dim 1 : vector<16x128xf32>, i32 -> vector<16x128xf32>
    %27 = vector.broadcast %5 : vector<1x128xf32> to vector<16x128xf32>
    %28 = arith.mulf %26, %27 : vector<16x128xf32>
    %29 = arith.addf %25, %28 : vector<16x128xf32>
    %c2_i32 = arith.constant 2 : i32
    %30 = tpu.dynamic_rotate %11 by %c2_i32 dim 1 : vector<16x128xf32>, i32 -> vector<16x128xf32>
    %31 = vector.broadcast %6 : vector<1x128xf32> to vector<16x128xf32>
    %32 = arith.mulf %30, %31 : vector<16x128xf32>
    %33 = arith.addf %29, %32 : vector<16x128xf32>
    %c3_i32 = arith.constant 3 : i32
    %34 = tpu.dynamic_rotate %11 by %c3_i32 dim 1 : vector<16x128xf32>, i32 -> vector<16x128xf32>
    %35 = vector.broadcast %7 : vector<1x128xf32> to vector<16x128xf32>
    %36 = arith.mulf %34, %35 : vector<16x128xf32>
    %37 = arith.addf %33, %36 : vector<16x128xf32>
    %38 = arith.index_cast %9 : i32 to index
    %c0_2 = arith.constant 0 : index
    %39 = vector.load %arg3[%38, %c0_2] : memref<16x128xf32, #tpu.memory_space<vmem>>, vector<16x128xf32>
    tpu.vector_store %arg3[%38, %c0_2], %37 {strides = array<i32>} : memref<16x128xf32, #tpu.memory_space<vmem>>, vector<16x128xf32>,
    %c1_i32_3 = arith.constant 1 : i32
    return
  }
  func.func @transform_0(%arg0: i32) -> (i32, i32) {
    %c0_i32 = arith.constant 0 : i32
    %c0_i32_0 = arith.constant 0 : i32
    return %arg0, %c0_i32 : i32, i32
  }
  func.func @transform_1(%arg0: i32) -> (i32, i32) {
    %c0_i32 = arith.constant 0 : i32
    %c0_i32_0 = arith.constant 0 : i32
    %c0_i32_1 = arith.constant 0 : i32
    return %c0_i32, %c0_i32_0 : i32, i32
  }
  func.func @transform_2(%arg0: i32) -> (i32, i32) {
    %c0_i32 = arith.constant 0 : i32
    %c0_i32_0 = arith.constant 0 : i32
    return %arg0, %c0_i32 : i32, i32
  }
}

</mosaic_0001>

<bundles_post_ra>
// kernel: tpu_custom_call.1
= control target key start
LH: loop header
LB: loop body
LE: loop exit
PB: predicated region body
PF: predicated region fallthrough
CT: control target
= control target key end

     0   :  { %7 = vsyncpa [#allocation3], 0  ;;  %s254_s0 = inlined_call_operand.hbm [shape: f32[16,128], index: 0, kind: input, shape index: {}]   ;;  %s255_s1 = inlined_call_operand.hbm [shape: f32[8,128], index: 1, kind: input, shape index: {}]   ;;  %s256_s2 = inlined_call_operand.hbm [shape: f32[16,128], index: 2, kind: output, shape index: {}]  }
   0x1   :  { %8 = vsyncpa [#allocation6], 0 }
   0x2   :  { %9 = vsyncpa [#allocation4], 0  ;;  %s14_s11 = sshll.u32 %s254_s0, 4  ;;  %s213_s12 = smov [#allocation2]   ;;  %s15_s11 = int_to_ptr.hbm [resolvable:$true] %s14_s11 }
   0x3   :  { %s16_s13 = sshll.u32 %s213_s12, 4  ;;  %s28_s16 = sshll.u32 %s255_s1, 4  ;;  %s17_s13 = int_to_ptr.vmem [resolvable:$true] %s16_s13  ;;  %s29_s16 = int_to_ptr.hbm [resolvable:$true] %s28_s16 }
   0x4   :  { %s214_s17 = smov 128   ;;  %s215_s18 = smov 8  }
   0x5   :  { %22 = dma.hbm_to_vmem [thread:$0]  %s15_s11, 256, %s17_s13, [#allocation3], %s214_s17, %s214_s17, %s215_s18  }
   0x6   :  { %s216_s19 = smov [#allocation5]  }
   0x7   :  { %s30_s20 = sshll.u32 %s216_s19, 4  ;;  %s31_s20 = int_to_ptr.vmem [resolvable:$true] %s30_s20 }
   0x8   :  { %33 = dma.hbm_to_vmem [thread:$0]  %s29_s16, 128, %s31_s20, [#allocation6]  }
   0x9   :  { %207 = dma.done.wait [#allocation3], 256  }
   0xa   :  { %208 = vsyncadd [#allocation3], 4294967040 }
   0xb   :  { %209 = dma.done.wait [#allocation6], 128  }
   0xc   :  { %210 = vsyncadd [#allocation6], 4294967168  ;;  %v43_v0 = vld [vmem:[#allocation2] sm:$0xff]  ;;  %s217_s0 = smov 126   ;;  %s218_s21 = smov 125   ;;  %v44_v1 = vld [vmem:[#allocation2 + $0x8] sm:$0xff] }
   0xd   :  { %57 = vrot.lane.b32.xlu1 %v43_v0, %s217_s0  ;;  %48 = vrot.lane.b32.xlu0 %v43_v0, %s218_s21  ;;  %s219_s1 = smov 127   ;;  %s220_s22 = smov 1   ;;  %v42_v4 = vld [vmem:[#allocation5] sm:$0xff] }
   0xe   :  { %66 = vrot.lane.b32.xlu2 %v43_v0, %s219_s1  ;;  %s221_s23 = smov 2   ;;  %s222_s24 = smov 3   ;;  %v45_v7 = vperm.slane %v42_v4, 3  ;;  %v52_v8 = vperm.slane %v42_v4, 0  ;;  %v61_v9 = vperm.slane %v42_v4, 1  ;;  %v70_v19 = vperm.slane %v42_v4, 2 }
   0xf   :  { %v79_v20 = vperm.slane %v42_v4, 4  ;;  %v88_v28 = vperm.slane %v42_v4, 5  ;;  %v97_v35 = vperm.slane %v42_v4, 6  ;;  %s223_s25 = smov [#allocation7]   ;;  %s110_s29 = sshll.u32 %s256_s2, 4  ;;  %s111_s29 = int_to_ptr.hbm [resolvable:$true] %s110_s29 }
  0x10   :  { %v46_v10 = vmul.f32 %v45_v7, %v43_v0  ;;  %v47_v16 = vmul.f32 %v45_v7, %v44_v1  ;;  %s108_s26 = sshll.u32 %s223_s25, 4  ;;  %s109_s26 = int_to_ptr.vmem [resolvable:$true] %s108_s26 }
  0x15   :  { %59 = vrot.lane.b32.xlu1 %v44_v1, %s217_s0  ;;  %50 = vrot.lane.b32.xlu0 %v44_v1, %s218_s21 }
  0x16   :  { %68 = vrot.lane.b32.xlu2 %v44_v1, %s219_s1 }
  0x1d   :  { %77 = vrot.lane.b32.xlu1 %v44_v1, %s220_s22  ;;  %75 = vrot.lane.b32.xlu0 %v43_v0, %s220_s22 }
  0x1e   :  { %84 = vrot.lane.b32.xlu2 %v43_v0, %s221_s23 }
  0x25   :  { %93 = vrot.lane.b32.xlu1 %v43_v0, %s222_s24  ;;  %86 = vrot.lane.b32.xlu0 %v44_v1, %s221_s23 }
  0x26   :  { %95 = vrot.lane.b32.xlu2 %v44_v1, %s222_s24 }
  0x68   :  { %v67_v2 = vpop.permute.xlu2 %66 }
  0x69   :  { %v71_v26 = vmul.f32 %v70_v19, %v67_v2 }
  0x70   :  { %v69_v6 = vpop.permute.xlu2 %68 }
  0x71   :  { %v72_v31 = vmul.f32 %v70_v19, %v69_v6 }
  0x78   :  { %v85_v18 = vpop.permute.xlu2 %84 }
  0x79   :  { %v89_v34 = vmul.f32 %v88_v28, %v85_v18 }
  0x7f   :  { %v58_v3 = vpop.permute.xlu1 %57  ;;  %v49_v5 = vpop.permute.xlu0 %48 }
  0x80   :  { %v53_v11 = vmul.f32 %v52_v8, %v49_v5  ;;  %v62_v14 = vmul.f32 %v61_v9, %v58_v3  ;;  %v96_v36 = vpop.permute.xlu2 %95 }
  0x81   :  { %v99_v40 = vmul.f32 %v97_v35, %v96_v36 }
  0x82   :  { %v55_v15 = vadd.f32 %v53_v11, %v46_v10 }
  0x84   :  { %v64_v21 = vadd.f32 %v62_v14, %v55_v15 }
  0x86   :  { %v73_v29 = vadd.f32 %v71_v26, %v64_v21 }
  0x87   :  { %v60_v12 = vpop.permute.xlu1 %59  ;;  %v51_v13 = vpop.permute.xlu0 %50 }
  0x88   :  { %v54_v17 = vmul.f32 %v52_v8, %v51_v13  ;;  %v63_v22 = vmul.f32 %v61_v9, %v60_v12 }
  0x8a   :  { %v56_v23 = vadd.f32 %v54_v17, %v47_v16 }
  0x8c   :  { %v65_v30 = vadd.f32 %v63_v22, %v56_v23 }
  0x8e   :  { %v74_v37 = vadd.f32 %v72_v31, %v65_v30 }
  0x8f   :  { %v78_v24 = vpop.permute.xlu1 %77  ;;  %v76_v25 = vpop.permute.xlu0 %75 }
  0x90   :  { %v80_v27 = vmul.f32 %v79_v20, %v76_v25  ;;  %v81_v32 = vmul.f32 %v79_v20, %v78_v24 }
  0x92   :  { %v82_v33 = vadd.f32 %v80_v27, %v73_v29  ;;  %v83_v41 = vadd.f32 %v81_v32, %v74_v37 }
  0x94   :  { %v91_v42 = vadd.f32 %v89_v34, %v82_v33 }
  0x97   :  { %v94_v38 = vpop.permute.xlu1 %93  ;;  %v87_v39 = vpop.permute.xlu0 %86 }
  0x98   :  { %v98_v43 = vmul.f32 %v97_v35, %v94_v38  ;;  %v90_v44 = vmul.f32 %v88_v28, %v87_v39 }
  0x9a   :  { %v100_v45 = vadd.f32 %v98_v43, %v91_v42  ;;  %v92_v46 = vadd.f32 %v90_v44, %v83_v41 }
  0x9c   :  { %102 = vst [vmem:[#allocation7] sm:$0xff] %v100_v45  ;;  %v101_v47 = vadd.f32 %v99_v40, %v92_v46 }
  0x9e   :  { %103 = vst [vmem:[#allocation7 + $0x8] sm:$0xff] %v101_v47 }
  0x9f   :  { %116 = dma.vmem_to_hbm [thread:$0]  %s109_s26, 256, %s111_s29, [#allocation4], %s214_s17, %s214_s17, %s215_s18  }
  0xa0   :  { %211 = dma.done.wait [#allocation4], 256  }
  0xa1   :  { %212 = vsyncadd [#allocation4], 4294967040 }
  0xa2   :  { %121 = vsyncpa [#allocation3], 1 }
  0xa3   :  { %122 = vsyncpa [#allocation6], 1 }
  0xa4   :  { %123 = vsyncpa [#allocation4], 1 }

</bundles_post_ra>
